<compile_context>
chip_gen: v6e
topology: v6e:2x2x1
jax: 0.10.0
libtpu: 0.0.40
codegen_flags: <defaults>
</compile_context>

<pallas_src>
import jax
import jax.numpy as jnp
from jax.experimental import pallas as pl
from jax.experimental.pallas import tpu as pltpu


def _rpad(n, m):
    return ((n + m - 1) // m) * m


def _pick_tile(padded):
    for t in (512, 256, 128):
        if padded % t == 0:
            return t
    return 128


# -----------------------------------------------------------------------------
# Linear layers:  y = x @ W^T (+ b)
# Single full-extent K block (K = dim <= 4096 here), no accumulator scratch,
# all-parallel grid, weight consumed untransposed (NT matmul on the MXU),
# bias DMA skipped entirely when bias is None.  bf16 operands, f32 accumulate.
# -----------------------------------------------------------------------------
_NT = (((1,), (1,)), ((), ()))     # contract last dim of A with last dim of W


def _linear_bias_kernel(a_ref, w_ref, b_ref, o_ref):
    acc = jax.lax.dot_general(a_ref[...], w_ref[...], _NT,
                              preferred_element_type=jnp.float32)
    o_ref[...] = (acc + b_ref[...]).astype(o_ref.dtype)


def _linear_kernel(a_ref, w_ref, o_ref):
    acc = jax.lax.dot_general(a_ref[...], w_ref[...], _NT,
                              preferred_element_type=jnp.float32)
    o_ref[...] = acc.astype(o_ref.dtype)


def linear(x, w, b=None, out_dtype=jnp.float32):
    """x: (..., K); w: (N, K); b: (N,) or None."""
    *lead, K = x.shape
    N = w.shape[0]
    M = 1
    for d in lead:
        M *= d
    a = x.reshape(M, K)

    # Degenerate GEMV shapes / very deep K: plain XLA dot.
    # TODO(synk): add a K-tiled accumulator kernel if dim ever exceeds 4096.
    if M < 16 or N < 16 or K > 4096:
        y = jnp.dot(a.astype(jnp.float32), w.astype(jnp.float32).T)
        if b is not None:
            y = y + b.astype(jnp.float32)
        return y.astype(out_dtype).reshape(*lead, N)

    Mp, Np = _rpad(M, 128), _rpad(N, 128)
    tm, tn = _pick_tile(Mp), _pick_tile(Np)
    # v7x has two TensorCores sharded over the parallel grid axes: make sure
    # there are at least two grid steps whenever the problem allows it.
    while (Mp // tm) * (Np // tn) < 2 and tm > 128:
        tm //= 2
    while (Mp // tm) * (Np // tn) < 2 and tn > 128:
        tn //= 2

    # Cast to bf16 *before* padding so cast+pad fuse into a single pass.
    a_p = jnp.pad(a.astype(jnp.bfloat16), ((0, Mp - M), (0, 0)))
    w_p = jnp.pad(w.astype(jnp.bfloat16), ((0, Np - N), (0, 0)))

    in_specs = [pl.BlockSpec((tm, K), lambda i, j: (i, 0)),
                pl.BlockSpec((tn, K), lambda i, j: (j, 0))]
    operands = [a_p, w_p]
    kernel = _linear_kernel
    if b is not None:
        b_p = jnp.pad(b.astype(jnp.float32), (0, Np - N)).reshape(1, Np)
        in_specs.append(pl.BlockSpec((1, tn), lambda i, j: (0, j)))
        operands.append(b_p)
        kernel = _linear_bias_kernel

    out = pl.pallas_call(
        kernel,
        out_shape=jax.ShapeDtypeStruct((Mp, Np), out_dtype),
        grid_spec=pltpu.PrefetchScalarGridSpec(
            num_scalar_prefetch=0,
            grid=(Mp // tm, Np // tn),
            in_specs=in_specs,
            out_specs=pl.BlockSpec((tm, tn), lambda i, j: (i, j)),
        ),
        compiler_params=pltpu.CompilerParams(
            dimension_semantics=("parallel", "parallel"),
            vmem_limit_bytes=32 * 1024 * 1024),
    )(*operands)
    return out[:M, :N].reshape(*lead, N)


# -----------------------------------------------------------------------------
# Fused multi-head attention.
# qkv3: (3, B*nh, N, hd) bf16, Q already carries the qk scale.
# All heads of one batch (G = nh) are packed into one grid step.
#   * short sequences -> single-pass softmax, K/V one full-extent VMEM block,
#                        grid (B, Nq): no scratch, no online rescale.
#   * long sequences  -> online-softmax kernel with a tiled KV grid axis.
# -----------------------------------------------------------------------------
_NEG = -1e30      # large finite negative (avoids exp(-inf - -inf) = NaN)


def _attn_single_kernel_factory(n_valid, n_kv):
    need_mask = n_kv != n_valid

    def kernel(q_ref, k_ref, v_ref, o_ref):
        v = v_ref[...]
        s = jnp.einsum('gqd,gkd->gqk', q_ref[...], k_ref[...],
                       preferred_element_type=jnp.float32)
        if need_mask:
            col = jax.lax.broadcasted_iota(jnp.int32, s.shape, 2)
            s = jnp.where(col < n_valid, s, _NEG)
        m = jnp.max(s, axis=-1, keepdims=True)
        p = jnp.exp(s - m)
        l = jnp.sum(p, axis=-1, keepdims=True)
        o = jnp.einsum('gqk,gkd->gqd', p.astype(v.dtype), v,
                       preferred_element_type=jnp.float32)
        o_ref[...] = (o * pl.reciprocal(l, approx=True)).astype(o_ref.dtype)

    return kernel


def _attn_online_kernel_factory(n_valid, blk_k, nk):
    need_mask = blk_k * nk != n_valid

    def kernel(q_ref, k_ref, v_ref, o_ref, m_sc, l_sc, acc_sc):
        ki = pl.program_id(2)

        @pl.when(ki == 0)
        def _init():
            m_sc[...] = jnp.full_like(m_sc, _NEG)
            l_sc[...] = jnp.zeros_like(l_sc)
            acc_sc[...] = jnp.zeros_like(acc_sc)

        s = jnp.einsum('gqd,gkd->gqk', q_ref[...], k_ref[...],
                       preferred_element_type=jnp.float32)
        if need_mask:
            # Only the last KV block has padded columns; one iota + compare
            # per grid step, hoisted out of all inner math.
            col = jax.lax.broadcasted_iota(jnp.int32, s.shape, 2) + ki * blk_k
            s = jnp.where(col < n_valid, s, _NEG)

        m_prev = m_sc[...]
        m_new = jnp.maximum(m_prev, jnp.max(s, axis=-1, keepdims=True))
        alpha = jnp.exp(m_prev - m_new)
        p = jnp.exp(s - m_new)
        l_sc[...] = alpha * l_sc[...] + jnp.sum(p, axis=-1, keepdims=True)
        acc_sc[...] = alpha * acc_sc[...] + jnp.einsum(
            'gqk,gkd->gqd', p.astype(v_ref.dtype), v_ref[...],
            preferred_element_type=jnp.float32)
        m_sc[...] = m_new

        @pl.when(ki == nk - 1)
        def _fin():
            o_ref[...] = (acc_sc[...] *
                          pl.reciprocal(l_sc[...], approx=True)
                          ).astype(o_ref.dtype)

    return kernel


def fused_attention(qkv3, num_heads, n_valid, *,
                    vmem_budget_bytes=24 * 1024 * 1024, blk_cap=256):
    """softmax(q k^T) v for qkv3 = (3, B*nh, N, hd) with pre-scaled Q.

    Returns (B*nh, N, hd) bf16.
    """
    _, BH, N, hd = qkv3.shape
    G = num_heads                      # heads packed per grid step
    assert BH % G == 0
    qkv3 = qkv3.astype(jnp.bfloat16)

    blk_q = min(blk_cap, _rpad(N, 8))
    n_pad_est = _rpad(N, blk_q)
    hd_pad = max(hd, 128)              # lane padding of the head dim in VMEM
    vmem_est = (3 * 2 * G * n_pad_est * hd_pad * 2     # q/k/v blocks, dbuf, bf16
                + 2 * G * blk_q * n_pad_est * 4        # s / p transients, f32
                + 2 * G * blk_q * hd_pad * 4)          # out block + slack
    single = vmem_est <= vmem_budget_bytes

    if single:
        n_pad = _rpad(N, blk_q)
        blk_k, nk = n_pad, 1
    else:
        blk_q = blk_k = min(blk_cap, 256)
        n_pad = _rpad(N, blk_q)
        nk = n_pad // blk_k

    if n_pad != N:
        qkv3 = jnp.pad(qkv3, ((0, 0), (0, 0), (0, n_pad - N), (0, 0)))

    out_shape = jax.ShapeDtypeStruct((BH, n_pad, hd), jnp.bfloat16)
    cparams = pltpu.CompilerParams(
        dimension_semantics=(("parallel", "parallel") if single
                             else ("parallel", "parallel", "arbitrary")),
        vmem_limit_bytes=32 * 1024 * 1024)

    if single:
        out = pl.pallas_call(
            _attn_single_kernel_factory(n_valid, n_pad),
            out_shape=out_shape,
            grid_spec=pltpu.PrefetchScalarGridSpec(
                num_scalar_prefetch=0,
                grid=(BH // G, n_pad // blk_q),
                in_specs=[
                    pl.BlockSpec((None, G, blk_q, hd),
                                 lambda g, qi: (0, g, qi, 0)),
                    pl.BlockSpec((None, G, n_pad, hd),
                                 lambda g, qi: (1, g, 0, 0)),
                    pl.BlockSpec((None, G, n_pad, hd),
                                 lambda g, qi: (2, g, 0, 0)),
                ],
                out_specs=pl.BlockSpec((G, blk_q, hd),
                                       lambda g, qi: (g, qi, 0)),
            ),
            compiler_params=cparams,
        )(qkv3, qkv3, qkv3)
    else:
        out = pl.pallas_call(
            _attn_online_kernel_factory(n_valid, blk_k, nk),
            out_shape=out_shape,
            grid_spec=pltpu.PrefetchScalarGridSpec(
                num_scalar_prefetch=0,
                grid=(BH // G, n_pad // blk_q, nk),
                in_specs=[
                    pl.BlockSpec((None, G, blk_q, hd),
                                 lambda g, qi, ki: (0, g, qi, 0)),
                    pl.BlockSpec((None, G, blk_k, hd),
                                 lambda g, qi, ki: (1, g, ki, 0)),
                    pl.BlockSpec((None, G, blk_k, hd),
                                 lambda g, qi, ki: (2, g, ki, 0)),
                ],
                out_specs=pl.BlockSpec((G, blk_q, hd),
                                       lambda g, qi, ki: (g, qi, 0)),
                scratch_shapes=[
                    pltpu.VMEM((G, blk_q, 1), jnp.float32),
                    pltpu.VMEM((G, blk_q, 1), jnp.float32),
                    pltpu.VMEM((G, blk_q, hd), jnp.float32),
                ],
            ),
            compiler_params=cparams,
        )(qkv3, qkv3, qkv3)

    return out[:, :N, :] if n_pad != N else out


# -----------------------------------------------------------------------------
# Attention module: params + forward (attn_drop / proj_drop identity, p=0.0).
# -----------------------------------------------------------------------------
def init_attention(key, dim, num_heads=8, qkv_bias=False, qk_scale=None):
    kq, kp = jax.random.split(key)
    hd = dim // num_heads
    return {
        'num_heads': num_heads,
        'scale': float(qk_scale) if qk_scale is not None else hd ** (-0.5),
        'qkv': {'w': (0.02 * jax.random.normal(kq, (3 * dim, dim))).astype(jnp.float32),
                'b': jnp.zeros((3 * dim,), jnp.float32) if qkv_bias else None},
        'proj': {'w': (0.02 * jax.random.normal(kp, (dim, dim))).astype(jnp.float32),
                 'b': jnp.zeros((dim,), jnp.float32)},
    }


def attention_forward(x, p):
    """Mirror of Attention.forward."""
    B, N, C = x.shape
    nh = p['num_heads']
    hd = C // nh

    # Fold the qk scale into the Q rows of the qkv weight/bias (a weight-sized
    # op) instead of a q * scale pass over the activations.
    w_qkv = p['qkv']['w'].at[:C].multiply(p['scale'])
    b_qkv = p['qkv']['b']
    if b_qkv is not None:
        b_qkv = b_qkv.at[:C].multiply(p['scale'])

    qkv = linear(x, w_qkv, b_qkv, out_dtype=jnp.bfloat16)       # (B, N, 3C) bf16
    # Head split: one fused XLA transpose pass over the bf16 activation.
    # TODO(synk): fold this reorder into the flash BlockSpec index maps
    # (needs head-split 5-D blocks); kept as a single transpose pass for now.
    qkv3 = (qkv.reshape(B, N, 3, nh, hd)
               .transpose(2, 0, 3, 1, 4)
               .reshape(3, B * nh, N, hd))
    o = fused_attention(qkv3, nh, N)                            # (B*nh, N, hd) bf16
    o = o.reshape(B, nh, N, hd).transpose(0, 2, 1, 3).reshape(B, N, C)
    return linear(o, p['proj']['w'], p['proj']['b'], out_dtype=jnp.float32)


def attention_reference(x, p):
    """Pure-jnp f32 reference (mirrors the PyTorch forward exactly)."""
    B, N, C = x.shape
    nh = p['num_heads']
    hd = C // nh
    qkv = x @ p['qkv']['w'].T
    if p['qkv']['b'] is not None:
        qkv = qkv + p['qkv']['b']
    qkv = qkv.reshape(B, N, 3, nh, hd).transpose(2, 0, 3, 1, 4)
    q, k, v = qkv[0], qkv[1], qkv[2]
    attn = jnp.einsum('bhqd,bhkd->bhqk', q, k) * p['scale']
    attn = jax.nn.softmax(attn, axis=-1)
    o = jnp.einsum('bhqk,bhkd->bhqd', attn, v)
    o = o.transpose(0, 2, 1, 3).reshape(B, N, C)
    return o @ p['proj']['w'].T + p['proj']['b']


# -----------------------------------------------------------------------------
if __name__ == "__main__":
    key = jax.random.PRNGKey(0)
    kparam, kx = jax.random.split(key)

    B, N, dim, heads = 2, 200, 64, 8          # small; N not a multiple of 128
    params = init_attention(kparam, dim, num_heads=heads)
    x = jax.random.normal(kx, (B, N, dim), jnp.float32)

    out = jax.block_until_ready(attention_forward(x, params))
    assert out.shape == (B, N, dim)
    assert bool(jnp.all(jnp.isfinite(out)))

    ref = attention_reference(x, params)
    err = float(jnp.max(jnp.abs(out - ref)))
    assert err < 2e-2, f"max abs err {err}"

    # Also exercise the long-sequence path (tiled KV axis, online softmax,
    # padded-column masking) on a small problem by shrinking the VMEM budget.
    hd = dim // heads
    qkv3 = 0.5 * jax.random.normal(jax.random.PRNGKey(1),
                                   (3, B * heads, N, hd), jnp.float32)
    o_tiled = jax.block_until_ready(
        fused_attention(qkv3, heads, N, vmem_budget_bytes=0, blk_cap=128))
    qkv_bf = qkv3.astype(jnp.bfloat16).astype(jnp.float32)
    attn_ref = jax.nn.softmax(
        jnp.einsum('gqd,gkd->gqk', qkv_bf[0], qkv_bf[1]), axis=-1)
    o_ref2 = jnp.einsum('gqk,gkd->gqd', attn_ref, qkv_bf[2])
    err2 = float(jnp.max(jnp.abs(o_tiled.astype(jnp.float32) - o_ref2)))
    assert err2 < 2e-2, f"online-path max abs err {err2}"

    print("KERNEL_OK")
</pallas_src>

<mosaic_0001>
module attributes {stable_mosaic.version = 11 : i64} {
  func.func @_linear_kernel(%arg0: i32, %arg1: i32, %arg2: memref<256x64xbf16, #tpu.memory_space<vmem>>, %arg3: memref<256x64xbf16, #tpu.memory_space<vmem>>, %arg4: memref<256x256xbf16, #tpu.memory_space<vmem>>) attributes {dimension_semantics = [#tpu.dimension_semantics<parallel>, #tpu.dimension_semantics<parallel>], iteration_bounds = array<i64: 2, 1>, scalar_prefetch = 0 : i64, scratch_operands = 0 : i64, tpu.core_type = #tpu.core_type<tc>, window_params = [{transform_indices = @transform_0, window_bounds = array<i64: 256, 64>}, {transform_indices = @transform_1, window_bounds = array<i64: 256, 64>}, {transform_indices = @transform_2, window_bounds = array<i64: 256, 256>}]} {
    %c0 = arith.constant 0 : index
    %c0_0 = arith.constant 0 : index
    %0 = vector.load %arg2[%c0, %c0_0] : memref<256x64xbf16, #tpu.memory_space<vmem>>, vector<256x64xbf16>
    %c0_1 = arith.constant 0 : index
    %c0_2 = arith.constant 0 : index
    %1 = vector.load %arg3[%c0_1, %c0_2] : memref<256x64xbf16, #tpu.memory_space<vmem>>, vector<256x64xbf16>
    %cst = arith.constant dense<0.000000e+00> : vector<256x256xf32>
    %2 = tpu.matmul %0, %1, %cst {dimension_numbers = #tpu.dot_dimension_numbers<[1], [1], [0], [0], [0, 0, 1, 0], [], []>} : vector<256x64xbf16>, vector<256x64xbf16>, vector<256x256xf32> -> vector<256x256xf32>
    %3 = arith.truncf %2 : vector<256x256xf32> to vector<256x256xbf16>
    %c0_3 = arith.constant 0 : index
    %c0_4 = arith.constant 0 : index
    %4 = vector.load %arg4[%c0_3, %c0_4] : memref<256x256xbf16, #tpu.memory_space<vmem>>, vector<256x256xbf16>
    tpu.vector_store %arg4[%c0_3, %c0_4], %3 {strides = array<i32>} : memref<256x256xbf16, #tpu.memory_space<vmem>>, vector<256x256xbf16>,
    return
  }
  func.func @transform_0(%arg0: i32, %arg1: i32) -> (i32, i32) {
    %c0_i32 = arith.constant 0 : i32
    %c0_i32_0 = arith.constant 0 : i32
    return %arg0, %c0_i32 : i32, i32
  }
  func.func @transform_1(%arg0: i32, %arg1: i32) -> (i32, i32) {
    %c0_i32 = arith.constant 0 : i32
    %c0_i32_0 = arith.constant 0 : i32
    return %arg1, %c0_i32 : i32, i32
  }
  func.func @transform_2(%arg0: i32, %arg1: i32) -> (i32, i32) {
    %c0_i32 = arith.constant 0 : i32
    return %arg0, %arg1 : i32, i32
  }
}

</mosaic_0001>

<bundles_post_ra>
// kernel: tpu_custom_call.1
= control target key start
LH: loop header
LB: loop body
LE: loop exit
PB: predicated region body
PF: predicated region fallthrough
CT: control target
= control target key end

     0   :  { %7 = vsyncpa [#allocation3], 0  ;;  %s1694_s0 = inlined_call_operand.vmem [shape: bf16[512,64], index: 0, kind: input, shape index: {}]   ;;  %s1695_s1 = inlined_call_operand.vmem [shape: bf16[256,64], index: 1, kind: input, shape index: {}]   ;;  %s1696_s2 = inlined_call_operand.hbm [shape: bf16[512,256], index: 2, kind: output, shape index: {}]  }
   0x1   :  { %9 = vsyncpa [#allocation3 + $0x1], 0  ;;  %s1420_s9 = smov 0   ;;  %s1422_s10 = smov 0  }
   0x2   :  { %s1424_s11 = smov 0   ;;  %s1426_s12 = smov 0  }
   0x3   :  { %s1428_s13 = smov 0   ;;  %s1430_s14 = smov 0  }
   0x4 LB: > { %s1026_s15 = sadd.s32 4294967295, %s1400_s14   ;;  %s1027_s16 = sadd.s32 4294967294, %s1400_s14   ;;  %s1400_s14 = sphi %s1430_s14, %s15_s14   ;;  %s1396_s13 = sphi %s1428_s13, %s1703_s13   ;;  %s1392_s12 = sphi %s1426_s12, %s1702_s12   ;;  %s1388_s11 = sphi %s1424_s11, %s1701_s11   ;;  %s1384_s10 = sphi %s1422_s10, %s1700_s10   ;;  %s1380_s9 = sphi %s1420_s9, %s1699_s9  }
   0x5   : > { %s27_s17 = sadd.s32 1, %s1396_s13  ;;  %s88_s18 = sadd.s32 1, %s1388_s11 }
   0x6   : > { %p29_p0 = scmp.ge.s32.totalorder %s27_s17, 2  ;;  %p98_p1 = scmp.ne.s32.totalorder %s1388_s11, %s1384_s10 }
   0x7   : > { %p99_p2 = scmp.eq.s32.totalorder %s1026_s15, 1  ;;  %p104_p3 = scmp.ne.s32.totalorder %s1384_s10, %s1380_s9 }
   0x8   : > { %s1705_s17 = smov (%p29_p0, %s27_s17), 0  ;;  %p105_p5 = scmp.eq.s32.totalorder %s1027_s16, 1 }
   0x9   : > { %p1460_p4 = por %p99_p2, %p98_p1  ;;  %s83_s20 = ssub.s32 %s1396_s13, %s1705_s17 }
   0xa   : > { %p1031_p6 = scmp.ge.s32.totalorder %s1400_s14, 1  ;;  %p86_p7 = scmp.eq.s32.totalorder %s83_s20, 0 }
   0xb   : > { %p1467_p8 = por %p105_p5, %p104_p3  ;;  %p141_p9 = scmp.lt.s32.totalorder %s1400_s14, 3 }
   0xc   : > { %s1473_s22 = scalar_select %p86_p7, %s1388_s11, %s88_s18  }
   0xd   : > { %p142_p10 = pnand %p1031_p6, %p141_p9 }
   0xe   : > { %s1033_s27 = sshll.u32 (!%p142_p10), %s1392_s12, 5  ;;  %s165_s25 = sand.u32 (!%p142_p10), 1, %s1384_s10  }
   0xf   : > { %145 = sbr.rel (%p142_p10) target bundleno = 357 (0x165), region = 28  ;;  %p169_p11 = scmp.lt.s32.totalorder (!%p142_p10), %s1033_s27, 63 }
  0x10   : > { %s1032_s26 = sshll.u32 (!%p142_p10), %s165_s25, 8  ;;  %s1402_s5 = smov (!%p142_p10), [#allocation2]  }
  0x14   : > { %v1292_v0 = vld [vmem:[%s1695_s1 + $0x78] sm:$0xff]   ;;  %vm407_vm0 = vcmask 523264   ;;  %v1294_v2 = vld [vmem:[%s1695_s1 + $0x70] sm:$0xff]   ;;  %s1707_s27 = smov (!%p169_p11, %s1033_s27), 63  ;;  %v1296_v6 = vld [vmem:[%s1695_s1 + $0x68] sm:$0xff]  }
  0x15   : > { %v1293_v1 = vld [vmem:[%s1695_s1 + $0x38] sm:$0xff]   ;;  %1219 = vmatprep.subr.msk.bf16.mxu0 %vm407_vm0, %v1292_v0  ;;  %1220 = vmatprep.subr.msk.bf16.mxu1 %vm407_vm0, %v1292_v0  ;;  %v1295_v4 = vld [vmem:[%s1695_s1 + $0x30] sm:$0xff]   ;;  %s1034_s6 = sshll.u32 %s1707_s27, 2  ;;  %v1297_v7 = vld [vmem:[%s1695_s1 + $0x28] sm:$0xff]   ;;  %s1154_s27 = sshll.u32 %s1392_s12, 12 }
  0x16   : > { %v478_v3 = vsel %vm407_vm0, %v1293_v1, 0  ;;  %v475_v5 = vsel %vm407_vm0, %v1295_v4, 0  ;;  %s1505_s18 = scalar_lea.vmem %s1694_s0, %s1034_s6  ;;  %v1298_v8 = vld [vmem:[%s1695_s1 + $0x60] sm:$0xff]   ;;  %v472_v10 = vsel %vm407_vm0, %v1297_v7, 0  ;;  %v1300_v14 = vld [vmem:[%s1695_s1 + $0x58] sm:$0xff]   ;;  %v1302_v17 = vld [vmem:[%s1695_s1 + $0x50] sm:$0xff]   ;;  %s1641_s3 = scalar_lea.hbm %s1696_s2, %s1154_s27 }
  0x17   : > { %1156 = vmatpush3.bf16.xpose.msra.mxu0 %v478_v3  ;;  %1211 = vmatpush3.bf16.xpose.msra.mxu1 %v478_v3  ;;  %v1308_v9 = vld [vmem:[%s1505_s18] sm:$0xff]   ;;  %v1301_v15 = vld [vmem:[%s1695_s1 + $0x18] sm:$0xff]   ;;  %v1303_v18 = vld [vmem:[%s1695_s1 + $0x10] sm:$0xff]   ;;  %s1649_s12 = scalar_lea.sflag [#allocation3], %s165_s25  ;;  %s1328_s6 = sshll.u32 %s1402_s5, 4  ;;  %s1329_s6 = int_to_ptr.vmem [resolvable:$false] %s1328_s6 }
  0x18   : > { %1221 = vmatprep.subr.msk.bf16.mxu0 %vm407_vm0, %v1294_v2  ;;  %1222 = vmatprep.subr.msk.bf16.mxu1 %vm407_vm0, %v1294_v2  ;;  %v1309_v11 = vld [vmem:[%s1505_s18 + $0x40] sm:$0xff]   ;;  %v466_v16 = vsel %vm407_vm0, %v1301_v15, 0  ;;  %v463_v19 = vsel %vm407_vm0, %v1303_v18, 0  ;;  %v1304_v20 = vld [vmem:[%s1695_s1 + $0x48] sm:$0xff]   ;;  %v1312_v28 = vld [vmem:[%s1505_s18 + $0x10] sm:$0xff]   ;;  %s1330_s7 = scalar_lea.vmem %s1329_s6, 8192 }
  0x19   : > { %1171 = vmatprep.mubr.msk.bf16.mxu0 %vm407_vm0, %v1308_v9  ;;  %1187 = vmatprep.mubr.msk.bf16.mxu1 %vm407_vm0, %v1309_v11  ;;  %v1299_v12 = vld [vmem:[%s1695_s1 + $0x20] sm:$0xff]   ;;  %v1305_v21 = vld [vmem:[%s1695_s1 + $0x8] sm:$0xff]   ;;  %v1313_v29 = vld [vmem:[%s1505_s18 + $0x50] sm:$0xff]  }
  0x1a   : > { %v469_v13 = vsel %vm407_vm0, %v1299_v12, 0  ;;  %v460_v22 = vsel %vm407_vm0, %v1305_v21, 0  ;;  %v1306_v23 = vld [vmem:[%s1695_s1 + $0x40] sm:$0xff]   ;;  %v1310_v26 = vld [vmem:[%s1505_s18 + $0x8] sm:$0xff]   ;;  %v1314_v30 = vld [vmem:[%s1505_s18 + $0x18] sm:$0xff]  }
  0x1b   : > { %v1307_v24 = vld [vmem:[%s1695_s1] sm:$0xff]   ;;  %v1311_v27 = vld [vmem:[%s1505_s18 + $0x48] sm:$0xff]   ;;  %v1315_v31 = vld [vmem:[%s1505_s18 + $0x58] sm:$0xff]  }
  0x1c   : > { %v457_v25 = vsel %vm407_vm0, %v1307_v24, 0  ;;  %v1316_v32 = vld [vmem:[%s1505_s18 + $0x20] sm:$0xff]   ;;  %v1318_v34 = vld [vmem:[%s1505_s18 + $0x28] sm:$0xff]   ;;  %v1320_v36 = vld [vmem:[%s1505_s18 + $0x30] sm:$0xff]  }
  0x1d   : > { %v1317_v33 = vld [vmem:[%s1505_s18 + $0x60] sm:$0xff]   ;;  %v1319_v35 = vld [vmem:[%s1505_s18 + $0x68] sm:$0xff]   ;;  %v1321_v37 = vld [vmem:[%s1505_s18 + $0x70] sm:$0xff]  }
  0x1e   : > { %v1322_v38 = vld [vmem:[%s1505_s18 + $0x38] sm:$0xff]  }
  0x1f   : > { %1158 = vmatpush3.bf16.xpose.msra.mxu0 %v475_v5  ;;  %1212 = vmatpush3.bf16.xpose.msra.mxu1 %v475_v5  ;;  %v1323_v39 = vld [vmem:[%s1505_s18 + $0x78] sm:$0xff]   ;;  %s1604_s18 = scalar_lea.vmem [#allocation2], %s1032_s26 }
  0x20   : > { %1223 = vmatprep.subr.msk.bf16.mxu0 %vm407_vm0, %v1296_v6  ;;  %1224 = vmatprep.subr.msk.bf16.mxu1 %vm407_vm0, %v1296_v6  ;;  %s938_s28 = sshll.u32 %s1604_s18, 4  ;;  %s1643_s28 = int_to_ptr.vmem [resolvable:$true] %s938_s28 }
  0x21   : > { %s1324_s4 = scalar_lea.vmem %s1643_s28, 4096  ;;  %p1331_p1 = scmp.lt.s32.totalorder %s1643_s28, %s1329_s6 }
  0x22   : > { %p1325_p12 = scmp.ne.s32.totalorder %s1643_s28, %s1324_s4  ;;  %p1332_p2 = scmp.lt.s32.totalorder %s1330_s7, %s1324_s4 }
  0x24   : > { %p1326_p13 = pnand %p1325_p12, %p1460_p4  ;;  %p1333_p3 = por %p1332_p2, %p1331_p1 }
  0x26   : > { %p1327_p0 = pneg %p1326_p13 }
  0x27   : > { %1160 = vmatpush3.bf16.xpose.msra.mxu0 %v472_v10  ;;  %1213 = vmatpush3.bf16.xpose.msra.mxu1 %v472_v10 }
  0x28   : > { %1225 = vmatprep.subr.msk.bf16.mxu0 %vm407_vm0, %v1298_v8  ;;  %1226 = vmatprep.subr.msk.bf16.mxu1 %vm407_vm0, %v1298_v8  ;;  %p1334_p5 = pnand %p1333_p3, %p1327_p0 }
  0x2f   : > { %1162 = vmatpush3.bf16.xpose.msra.mxu0 %v469_v13  ;;  %1214 = vmatpush3.bf16.xpose.msra.mxu1 %v469_v13 }
  0x30   : > { %1227 = vmatprep.subr.msk.bf16.mxu0 %vm407_vm0, %v1300_v14  ;;  %1228 = vmatprep.subr.msk.bf16.mxu1 %vm407_vm0, %v1300_v14 }
  0x37   : > { %1164 = vmatpush3.bf16.xpose.msra.mxu0 %v466_v16  ;;  %1215 = vmatpush3.bf16.xpose.msra.mxu1 %v466_v16 }
  0x38   : > { %1229 = vmatprep.subr.msk.bf16.mxu0 %vm407_vm0, %v1302_v17  ;;  %1230 = vmatprep.subr.msk.bf16.mxu1 %vm407_vm0, %v1302_v17 }
  0x3f   : > { %1166 = vmatpush3.bf16.xpose.msra.mxu0 %v463_v19  ;;  %1216 = vmatpush3.bf16.xpose.msra.mxu1 %v463_v19 }
  0x40   : > { %1231 = vmatprep.subr.msk.bf16.mxu0 %vm407_vm0, %v1304_v20  ;;  %1232 = vmatprep.subr.msk.bf16.mxu1 %vm407_vm0, %v1304_v20 }
  0x47   : > { %1168 = vmatpush3.bf16.xpose.msra.mxu0 %v460_v22  ;;  %1217 = vmatpush3.bf16.xpose.msra.mxu1 %v460_v22 }
  0x48   : > { %1233 = vmatprep.subr.msk.bf16.mxu0 %vm407_vm0, %v1306_v23  ;;  %1234 = vmatprep.subr.msk.bf16.mxu1 %vm407_vm0, %v1306_v23 }
  0x4f   : > { %1170 = vmatpush3.bf16.xpose.msra.mxu0 %v457_v25  ;;  %1218 = vmatpush3.bf16.xpose.msra.mxu1 %v457_v25 }
  0x56   : > { %1172 = vmatmul.mubr.msk.bf16.vlgmr.msra.gmra.mxu0 %vm407_vm0, %v1308_v9  ;;  %1188 = vmatmul.mubr.msk.bf16.vlgmr.msra.gmra.mxu1 %vm407_vm0, %v1309_v11 }
  0x57   : > { %1173 = vmatprep.mubr.msk.bf16.mxu0 %vm407_vm0, %v1310_v26  ;;  %1189 = vmatprep.mubr.msk.bf16.mxu1 %vm407_vm0, %v1311_v27 }
  0x5e   : > { %1174 = vmatmul.mubr.msk.bf16.gmra.mxu0 %vm407_vm0, %v1310_v26  ;;  %1190 = vmatmul.mubr.msk.bf16.gmra.mxu1 %vm407_vm0, %v1311_v27 }
  0x5f   : > { %1175 = vmatprep.mubr.msk.bf16.mxu0 %vm407_vm0, %v1312_v28  ;;  %1191 = vmatprep.mubr.msk.bf16.mxu1 %vm407_vm0, %v1313_v29 }
  0x66   : > { %1176 = vmatmul.mubr.msk.bf16.gmra.mxu0 %vm407_vm0, %v1312_v28  ;;  %1192 = vmatmul.mubr.msk.bf16.gmra.mxu1 %vm407_vm0, %v1313_v29 }
  0x67   : > { %1177 = vmatprep.mubr.msk.bf16.mxu0 %vm407_vm0, %v1314_v30  ;;  %1193 = vmatprep.mubr.msk.bf16.mxu1 %vm407_vm0, %v1315_v31 }
  0x6e   : > { %1178 = vmatmul.mubr.msk.bf16.gmra.mxu0 %vm407_vm0, %v1314_v30  ;;  %1194 = vmatmul.mubr.msk.bf16.gmra.mxu1 %vm407_vm0, %v1315_v31 }
  0x6f   : > { %1179 = vmatprep.mubr.msk.bf16.mxu0 %vm407_vm0, %v1316_v32  ;;  %1195 = vmatprep.mubr.msk.bf16.mxu1 %vm407_vm0, %v1317_v33 }
  0x76   : > { %1180 = vmatmul.mubr.msk.bf16.gmra.mxu0 %vm407_vm0, %v1316_v32  ;;  %1196 = vmatmul.mubr.msk.bf16.gmra.mxu1 %vm407_vm0, %v1317_v33 }
  0x77   : > { %1181 = vmatprep.mubr.msk.bf16.mxu0 %vm407_vm0, %v1318_v34  ;;  %1197 = vmatprep.mubr.msk.bf16.mxu1 %vm407_vm0, %v1319_v35 }
  0x7e   : > { %1182 = vmatmul.mubr.msk.bf16.gmra.mxu0 %vm407_vm0, %v1318_v34  ;;  %1198 = vmatmul.mubr.msk.bf16.gmra.mxu1 %vm407_vm0, %v1319_v35 }
  0x7f   : > { %1183 = vmatprep.mubr.msk.bf16.mxu0 %vm407_vm0, %v1320_v36  ;;  %1199 = vmatprep.mubr.msk.bf16.mxu1 %vm407_vm0, %v1321_v37 }
  0x86   : > { %1184 = vmatmul.mubr.msk.bf16.gmra.mxu0 %vm407_vm0, %v1320_v36  ;;  %1200 = vmatmul.mubr.msk.bf16.gmra.mxu1 %vm407_vm0, %v1321_v37 }
  0x87   : > { %1185 = vmatprep.mubr.msk.bf16.mxu0 %vm407_vm0, %v1322_v38  ;;  %1201 = vmatprep.mubr.msk.bf16.mxu1 %vm407_vm0, %v1323_v39 }
  0x8e   : > { %1186 = vmatmul.mubr.msk.bf16.gmra.mxu0 %vm407_vm0, %v1322_v38  ;;  %1202 = vmatmul.mubr.msk.bf16.gmra.mxu1 %vm407_vm0, %v1323_v39 }
 0x116   : > { %v538_v40 = vpop.f32.mrf.mxu0  ;;  %v618_v41 = vpop.f32.mrf.mxu1 }
 0x118   : > { %v540_v42 = vpop.f32.mrf.mxu0  ;;  %v620_v43 = vpop.f32.mrf.mxu1 }
 0x119   : > { %v1121_v44 = vpack.c.bf16 %v540_v42, %v538_v40  ;;  %v1137_v45 = vpack.c.bf16 %v620_v43, %v618_v41 }
 0x11a   : > { %v542_v46 = vpop.f32.mrf.mxu0  ;;  %v622_v47 = vpop.f32.mrf.mxu1 }
 0x11b   : > { %889 = vst [vmem:[%s1604_s18] sm:$0xff] %v1121_v44  ;;  %905 = vst [vmem:[%s1604_s18 + $0x80] sm:$0xff] %v1137_v45 }
 0x11c   : > { %v544_v48 = vpop.f32.mrf.mxu0  ;;  %v624_v49 = vpop.f32.mrf.mxu1 }
 0x11d   : > { %v1122_v50 = vpack.c.bf16 %v544_v48, %v542_v46  ;;  %v1138_v51 = vpack.c.bf16 %v624_v49, %v622_v47 }
 0x11e   : > { %v548_v52 = vpop.f32.mrf.mxu0  ;;  %v628_v53 = vpop.f32.mrf.mxu1 }
 0x11f   : > { %890 = vst [vmem:[%s1604_s18 + $0x8] sm:$0xff] %v1122_v50  ;;  %906 = vst [vmem:[%s1604_s18 + $0x88] sm:$0xff] %v1138_v51 }
 0x120   : > { %v550_v54 = vpop.f32.mrf.mxu0  ;;  %v630_v55 = vpop.f32.mrf.mxu1 }
 0x121   : > { %v1123_v56 = vpack.c.bf16 %v550_v54, %v548_v52  ;;  %v1139_v57 = vpack.c.bf16 %v630_v55, %v628_v53 }
 0x122   : > { %v552_v58 = vpop.f32.mrf.mxu0  ;;  %v632_v59 = vpop.f32.mrf.mxu1 }
 0x123   : > { %891 = vst [vmem:[%s1604_s18 + $0x10] sm:$0xff] %v1123_v56  ;;  %907 = vst [vmem:[%s1604_s18 + $0x90] sm:$0xff] %v1139_v57 }
 0x124   : > { %v554_v60 = vpop.f32.mrf.mxu0  ;;  %v634_v61 = vpop.f32.mrf.mxu1 }
 0x125   : > { %v1124_v62 = vpack.c.bf16 %v554_v60, %v552_v58  ;;  %v1140_v63 = vpack.c.bf16 %v634_v61, %v632_v59 }
 0x126   : > { %v558_v0 = vpop.f32.mrf.mxu0  ;;  %v638_v1 = vpop.f32.mrf.mxu1 }
 0x127   : > { %892 = vst [vmem:[%s1604_s18 + $0x18] sm:$0xff] %v1124_v62  ;;  %908 = vst [vmem:[%s1604_s18 + $0x98] sm:$0xff] %v1140_v63 }
 0x128   : > { %v560_v2 = vpop.f32.mrf.mxu0  ;;  %v640_v3 = vpop.f32.mrf.mxu1 }
 0x129   : > { %v1125_v4 = vpack.c.bf16 %v560_v2, %v558_v0  ;;  %v1141_v5 = vpack.c.bf16 %v640_v3, %v638_v1 }
 0x12a   : > { %v562_v6 = vpop.f32.mrf.mxu0  ;;  %v642_v7 = vpop.f32.mrf.mxu1 }
 0x12b   : > { %893 = vst [vmem:[%s1604_s18 + $0x20] sm:$0xff] %v1125_v4  ;;  %909 = vst [vmem:[%s1604_s18 + $0xa0] sm:$0xff] %v1141_v5 }
 0x12c   : > { %v564_v8 = vpop.f32.mrf.mxu0  ;;  %v644_v9 = vpop.f32.mrf.mxu1 }
 0x12d   : > { %v1126_v10 = vpack.c.bf16 %v564_v8, %v562_v6  ;;  %v1142_v11 = vpack.c.bf16 %v644_v9, %v642_v7 }
 0x12e   : > { %v568_v12 = vpop.f32.mrf.mxu0  ;;  %v648_v13 = vpop.f32.mrf.mxu1 }
 0x12f   : > { %894 = vst [vmem:[%s1604_s18 + $0x28] sm:$0xff] %v1126_v10  ;;  %910 = vst [vmem:[%s1604_s18 + $0xa8] sm:$0xff] %v1142_v11 }
 0x130   : > { %v570_v14 = vpop.f32.mrf.mxu0  ;;  %v650_v15 = vpop.f32.mrf.mxu1 }
 0x131   : > { %v1127_v16 = vpack.c.bf16 %v570_v14, %v568_v12  ;;  %v1143_v17 = vpack.c.bf16 %v650_v15, %v648_v13 }
 0x132   : > { %v572_v18 = vpop.f32.mrf.mxu0  ;;  %v652_v19 = vpop.f32.mrf.mxu1 }
 0x133   : > { %895 = vst [vmem:[%s1604_s18 + $0x30] sm:$0xff] %v1127_v16  ;;  %911 = vst [vmem:[%s1604_s18 + $0xb0] sm:$0xff] %v1143_v17 }
 0x134   : > { %v574_v20 = vpop.f32.mrf.mxu0  ;;  %v654_v21 = vpop.f32.mrf.mxu1 }
 0x135   : > { %v1128_v22 = vpack.c.bf16 %v574_v20, %v572_v18  ;;  %v1144_v23 = vpack.c.bf16 %v654_v21, %v652_v19 }
 0x136   : > { %v578_v24 = vpop.f32.mrf.mxu0  ;;  %v658_v25 = vpop.f32.mrf.mxu1 }
 0x137   : > { %896 = vst [vmem:[%s1604_s18 + $0x38] sm:$0xff] %v1128_v22  ;;  %912 = vst [vmem:[%s1604_s18 + $0xb8] sm:$0xff] %v1144_v23 }
 0x138   : > { %v580_v26 = vpop.f32.mrf.mxu0  ;;  %v660_v27 = vpop.f32.mrf.mxu1 }
 0x139   : > { %v1129_v28 = vpack.c.bf16 %v580_v26, %v578_v24  ;;  %v1145_v29 = vpack.c.bf16 %v660_v27, %v658_v25 }
 0x13a   : > { %v582_v30 = vpop.f32.mrf.mxu0  ;;  %v662_v31 = vpop.f32.mrf.mxu1 }
 0x13b   : > { %897 = vst [vmem:[%s1604_s18 + $0x40] sm:$0xff] %v1129_v28  ;;  %913 = vst [vmem:[%s1604_s18 + $0xc0] sm:$0xff] %v1145_v29 }
 0x13c   : > { %v584_v32 = vpop.f32.mrf.mxu0  ;;  %v664_v33 = vpop.f32.mrf.mxu1 }
 0x13d   : > { %v1130_v34 = vpack.c.bf16 %v584_v32, %v582_v30  ;;  %v1146_v35 = vpack.c.bf16 %v664_v33, %v662_v31 }
 0x13e   : > { %v588_v36 = vpop.f32.mrf.mxu0  ;;  %v668_v37 = vpop.f32.mrf.mxu1 }
 0x13f   : > { %898 = vst [vmem:[%s1604_s18 + $0x48] sm:$0xff] %v1130_v34  ;;  %914 = vst [vmem:[%s1604_s18 + $0xc8] sm:$0xff] %v1146_v35 }
 0x140   : > { %v590_v38 = vpop.f32.mrf.mxu0  ;;  %v670_v39 = vpop.f32.mrf.mxu1 }
 0x141   : > { %v1131_v40 = vpack.c.bf16 %v590_v38, %v588_v36  ;;  %v1147_v41 = vpack.c.bf16 %v670_v39, %v668_v37 }
 0x142   : > { %v592_v42 = vpop.f32.mrf.mxu0  ;;  %v672_v43 = vpop.f32.mrf.mxu1 }
 0x143   : > { %899 = vst [vmem:[%s1604_s18 + $0x50] sm:$0xff] %v1131_v40  ;;  %915 = vst [vmem:[%s1604_s18 + $0xd0] sm:$0xff] %v1147_v41 }
 0x144   : > { %v594_v44 = vpop.f32.mrf.mxu0  ;;  %v674_v45 = vpop.f32.mrf.mxu1 }
 0x145   : > { %v1132_v46 = vpack.c.bf16 %v594_v44, %v592_v42  ;;  %v1148_v47 = vpack.c.bf16 %v674_v45, %v672_v43 }
 0x146   : > { %v598_v48 = vpop.f32.mrf.mxu0  ;;  %v678_v49 = vpop.f32.mrf.mxu1 }
 0x147   : > { %900 = vst [vmem:[%s1604_s18 + $0x58] sm:$0xff] %v1132_v46  ;;  %916 = vst [vmem:[%s1604_s18 + $0xd8] sm:$0xff] %v1148_v47 }
 0x148   : > { %v600_v50 = vpop.f32.mrf.mxu0  ;;  %v680_v51 = vpop.f32.mrf.mxu1 }
 0x149   : > { %v1133_v52 = vpack.c.bf16 %v600_v50, %v598_v48  ;;  %v1149_v53 = vpack.c.bf16 %v680_v51, %v678_v49 }
 0x14a   : > { %v602_v54 = vpop.f32.mrf.mxu0  ;;  %v682_v55 = vpop.f32.mrf.mxu1 }
 0x14b   : > { %901 = vst [vmem:[%s1604_s18 + $0x60] sm:$0xff] %v1133_v52  ;;  %917 = vst [vmem:[%s1604_s18 + $0xe0] sm:$0xff] %v1149_v53 }
 0x14c   : > { %v604_v56 = vpop.f32.mrf.mxu0  ;;  %v684_v57 = vpop.f32.mrf.mxu1 }
 0x14d   : > { %v1134_v58 = vpack.c.bf16 %v604_v56, %v602_v54  ;;  %v1150_v59 = vpack.c.bf16 %v684_v57, %v682_v55 }
 0x14e   : > { %v608_v60 = vpop.f32.mrf.mxu0  ;;  %v688_v61 = vpop.f32.mrf.mxu1 }
 0x14f   : > { %902 = vst [vmem:[%s1604_s18 + $0x68] sm:$0xff] %v1134_v58  ;;  %918 = vst [vmem:[%s1604_s18 + $0xe8] sm:$0xff] %v1150_v59 }
 0x150   : > { %v610_v62 = vpop.f32.mrf.mxu0  ;;  %v690_v63 = vpop.f32.mrf.mxu1 }
 0x151   : > { %v1135_v0 = vpack.c.bf16 %v610_v62, %v608_v60  ;;  %v1151_v1 = vpack.c.bf16 %v690_v63, %v688_v61 }
 0x152   : > { %v612_v2 = vpop.f32.mrf.mxu0  ;;  %v692_v3 = vpop.f32.mrf.mxu1 }
 0x153   : > { %903 = vst [vmem:[%s1604_s18 + $0x70] sm:$0xff] %v1135_v0  ;;  %919 = vst [vmem:[%s1604_s18 + $0xf0] sm:$0xff] %v1151_v1 }
 0x154   : > { %v614_v4 = vpop.f32.mrf.mxu0  ;;  %v694_v5 = vpop.f32.mrf.mxu1 }
 0x155   : > { %v1136_v6 = vpack.c.bf16 %v614_v4, %v612_v2  ;;  %v1152_v7 = vpack.c.bf16 %v694_v5, %v692_v3 }
 0x157   : > { %904 = vst [vmem:[%s1604_s18 + $0x78] sm:$0xff] %v1136_v6  ;;  %920 = vst [vmem:[%s1604_s18 + $0xf8] sm:$0xff] %v1152_v7 }
 0x158   : > { %1337 = shalt.err (!%p1334_p5)
}
 0x159   : > { %s1338_s8 = scalar_lea.hbm %s1641_s3, 4096  ;;  %s1342_s20 = scalar_lea.hbm %s1696_s2, 8192 }
 0x15a   : > { %p1339_p6 = scmp.ne.s32.totalorder %s1641_s3, %s1338_s8  ;;  %p1343_p10 = scmp.lt.s32.totalorder %s1641_s3, %s1696_s2 }
 0x15b   : > { %p1344_p11 = scmp.lt.s32.totalorder %s1342_s20, %s1338_s8 }
 0x15c   : > { %p1340_p7 = pnand %p1339_p6, %p1460_p4 }
 0x15d   : > { %p1345_p12 = por %p1344_p11, %p1343_p10 }
 0x15e   : > { %p1341_p9 = pneg %p1340_p7 }
 0x160   : > { %p1346_p13 = pnand %p1345_p12, %p1341_p9 }
 0x162   : > { %1349 = shalt.err (!%p1346_p13)
}
 0x163   : > { %s1403_s25 = smov 128   ;;  %s1404_s26 = smov 8  }
 0x164   : > { %1235 = dma.vmem_to_hbm [thread:$0]  (%p1460_p4), %s1643_s28, 4096, %s1641_s3, %s1649_s12, %s1403_s25, %s1403_s25, %s1404_s26  }
 0x165 PF: > { %p1241_p0 = scmp.ge.s32.totalorder %s1400_s14, 2  ;;  %s953_s18 = sand.u32 1, %s1380_s9  }
 0x166   : > { %s954_s27 = scalar_lea.sflag [#allocation3], %s953_s18 }
 0x167   : > { %p1238_p1 = pnand %p1241_p0, %p1467_p8 }
 0x169   : > { %p1239_p2 = pneg %p1238_p1 }
 0x16b   : > { %1375 = dma.done.wait (%p1239_p2), %s954_s27, 4096  }
 0x16c   : > { %1377 = vsyncadd (%p1239_p2), %s954_s27, 4294963200  ;;  %s15_s14 = sadd.s32 1, %s1400_s14   ;;  %s1699_s9 = smov %s1384_s10 }
 0x16d   : > { %p12_p3 = scmp.ge.s32.totalorder %s15_s14, 4   ;;  %s1700_s10 = smov %s1388_s11 }
 0x16e   : > { %s1701_s11 = smov %s1473_s22  ;;  %s1702_s12 = smov %s1396_s13 }
 0x16f   : > { %s1703_s13 = smov %s1705_s17  ;;  %14 = sbr.rel (!%p12_p3) target bundleno = 4 (0x4), region = 66 }
 0x174   :  { %959 = vsyncpa [#allocation3], 1 }
 0x175   :  { %961 = vsyncpa [#allocation3 + $0x1], 1 }

</bundles_post_ra>
